<compile_context>
chip_gen: v6e
topology: v6e:2x2x1
jax: 0.10.0
libtpu: 0.0.40
codegen_flags: <defaults>
</compile_context>

<pallas_src>
import math

import jax
import jax.numpy as jnp
from jax import lax
from jax.experimental import pallas as pl
from jax.experimental.pallas import tpu as pltpu

# dot_general dimension numbers: contract the LAST dim of both operands
# (the battle-tested "NT" matmul pattern, same as flash-attention q.k^T).
_NT_DIMS = (((1,), (1,)), ((), ()))


def dueling_dqn_kernel(x_ref, w1_ref, b1_ref, wh_ref, bh_ref, out_ref):
    # x block: (tb, in_dim) f32 -> cast to bf16 in-kernel (free VPU slot).
    x = x_ref[...].astype(jnp.bfloat16)

    # fc1, transposed: (hidden, in_dim)bf16 . (tb, in_dim)bf16^T -> (hidden, tb) f32.
    flat1_t = lax.dot_general(w1_ref[...], x, dimension_numbers=_NT_DIMS,
                              preferred_element_type=jnp.float32)
    flat1_t = jnp.maximum(flat1_t + b1_ref[...], 0.0)       # bias bcast over lanes

    # Fused value/advantage head: (8, hidden)bf16 . (hidden, tb)bf16 -> (8, tb) f32.
    head_t = jnp.dot(wh_ref[...], flat1_t.astype(jnp.bfloat16),
                     preferred_element_type=jnp.float32) + bh_ref[...]

    out_ref[...] = head_t.astype(out_ref.dtype)


def _pick_batch_tile(batch):
    """Batch tile on the lane axis of the (head_rows, B) output."""
    if batch < 256:
        # Small batch (acting path): single full-extent block.
        return batch
    # Large batch: big lane-dense tile (multiple of 128), but keep >= 2 grid
    # steps so the "parallel" axis can shard across v7x's two TensorCores.
    half = -(-batch // 2)                    # cdiv(batch, 2)
    half_lane = -(-half // 128) * 128        # round up to a lane multiple
    return min(1024, half_lane)


def dueling_dqn_forward(state, packed_params, n_actions):
    """Full DuelingDQN forward in one pallas_call.

    packed_params = (w1_bf16     (hidden, in_dim),
                     b1_f32      (hidden, 1),
                     w_head_bf16 (head_rows, hidden),   # [value; advantage; 0-pad]
                     b_head_f32  (head_rows, 1))
    Returns (value (B,1), advantage (B,n_actions)) in f32.
    """
    w1, b1, wh, bh = packed_params
    batch, in_dim = state.shape
    hidden, w1_in = w1.shape
    head_rows = wh.shape[0]

    # Correctness guards (see review): head packing must cover value + advantage.
    assert w1_in == in_dim, "state feature dim does not match packed W1"
    assert 1 + n_actions <= head_rows, "packed head too narrow for n_actions"
    assert wh.shape == (head_rows, hidden)
    assert b1.shape == (hidden, 1) and bh.shape == (head_rows, 1)

    tb = _pick_batch_tile(batch)
    grid = (pl.cdiv(batch, tb),)

    out = pl.pallas_call(
        dueling_dqn_kernel,
        out_shape=jax.ShapeDtypeStruct((head_rows, batch), jnp.float32),
        grid=grid,
        in_specs=[
            # batch-tiled activations (f32; cast to bf16 inside the kernel)
            pl.BlockSpec((tb, in_dim), lambda i: (i, 0)),
            # weights / biases: constant index_map -> VMEM-resident across grid
            pl.BlockSpec((hidden, in_dim), lambda i: (0, 0)),
            pl.BlockSpec((hidden, 1), lambda i: (0, 0)),
            pl.BlockSpec((head_rows, hidden), lambda i: (0, 0)),
            pl.BlockSpec((head_rows, 1), lambda i: (0, 0)),
        ],
        # (head_rows, tb) output tile: batch on the lane axis, 32 B/row writeback.
        out_specs=pl.BlockSpec((head_rows, tb), lambda i: (0, i)),
        compiler_params=pltpu.CompilerParams(
            dimension_semantics=("parallel",),
            vmem_limit_bytes=32 * 1024 * 1024,
        ),
    )(state, w1, b1, wh, bh)

    # Rows are contiguous: row 0 = value, rows 1..n_actions = advantage.
    value = out[:1, :].T                      # (B, 1)
    advantage = out[1:1 + n_actions, :].T     # (B, n_actions)
    return value, advantage


def init_params(key, input_dim, hidden, n_actions):
    """PyTorch-style (uniform +-1/sqrt(fan_in)) Linear init.

    Returns (packed_params for the kernel, raw f32 params for reference).
    Weights are kept in PyTorch layout (out_features, in_features), which is
    exactly what the transposed kernel dataflow wants.
    """
    ks = jax.random.split(key, 6)

    def linear(kw, kb, fan_in, fan_out):
        bound = 1.0 / math.sqrt(fan_in)
        w = jax.random.uniform(kw, (fan_out, fan_in), jnp.float32, -bound, bound)
        b = jax.random.uniform(kb, (fan_out,), jnp.float32, -bound, bound)
        return w, b

    w1, b1 = linear(ks[0], ks[1], input_dim, hidden)     # (512, in_dim), (512,)
    wv, bv = linear(ks[2], ks[3], hidden, 1)             # (1, 512), (1,)
    wa, ba = linear(ks[4], ks[5], hidden, n_actions)     # (n_actions, 512), (n_actions,)

    # Fuse the heads row-wise and zero-pad rows to a sublane multiple (>= 8).
    head_rows = max(8, -(-(1 + n_actions) // 8) * 8)
    assert 1 + n_actions <= head_rows
    head_w = jnp.concatenate([wv, wa], axis=0)           # (1+n_actions, hidden)
    head_b = jnp.concatenate([bv, ba], axis=0)           # (1+n_actions,)
    pad = head_rows - (1 + n_actions)
    head_w = jnp.pad(head_w, ((0, pad), (0, 0)))         # pad rows stay exactly zero
    head_b = jnp.pad(head_b, ((0, pad),))

    packed = (w1.astype(jnp.bfloat16),                   # (hidden, in_dim) bf16
              b1.reshape(hidden, 1),                     # (hidden, 1) f32
              head_w.astype(jnp.bfloat16),               # (head_rows, hidden) bf16
              head_b.reshape(head_rows, 1))              # (head_rows, 1) f32
    raw = (w1, b1, wv, bv, wa, ba)
    return packed, raw


if __name__ == "__main__":
    # LunarLander-v2: observation dim = 8, n_actions = 4; small batch of 8.
    batch, input_dim, hidden, n_actions = 8, 8, 512, 4

    key = jax.random.PRNGKey(0)
    pkey, xkey = jax.random.split(key)
    packed_params, raw_params = init_params(pkey, input_dim, hidden, n_actions)
    state = jax.random.normal(xkey, (batch, input_dim), jnp.float32)

    fwd = jax.jit(dueling_dqn_forward, static_argnums=(2,))
    value, advantage = fwd(state, packed_params, n_actions)
    jax.block_until_ready((value, advantage))

    assert value.shape == (batch, 1)
    assert advantage.shape == (batch, n_actions)

    # Reference 1: same bf16-operand math as the kernel (tight tolerance).
    w1_bf, b1_col, wh_bf, bh_col = packed_params
    hi = jax.lax.Precision.HIGHEST
    xb = state.astype(jnp.bfloat16).astype(jnp.float32)
    w1f = w1_bf.astype(jnp.float32)
    whf = wh_bf.astype(jnp.float32)
    flat1_ref = jnp.maximum(jnp.dot(xb, w1f.T, precision=hi) + b1_col.T, 0.0)
    head_ref = (jnp.dot(flat1_ref.astype(jnp.bfloat16).astype(jnp.float32),
                        whf.T, precision=hi) + bh_col.T)
    assert jnp.allclose(value, head_ref[:, :1], atol=2e-3, rtol=2e-3)
    assert jnp.allclose(advantage, head_ref[:, 1:1 + n_actions],
                        atol=2e-3, rtol=2e-3)

    # Reference 2: pure f32 PyTorch-equivalent math (loose tolerance; checks
    # bf16 MXU inputs did not change the answer materially).
    w1, b1, wv, bv, wa, ba = raw_params
    flat1_f32 = jnp.maximum(state @ w1.T + b1[None, :], 0.0)
    value_f32 = flat1_f32 @ wv.T + bv[None, :]
    adv_f32 = flat1_f32 @ wa.T + ba[None, :]
    assert jnp.allclose(value, value_f32, atol=5e-2, rtol=5e-2)
    assert jnp.allclose(advantage, adv_f32, atol=5e-2, rtol=5e-2)

    # TODO(synk): optimizer (Adam), MSELoss and checkpoint save/load are
    # training/IO-side and intentionally not part of this forward kernel.
    print("KERNEL_OK")
</pallas_src>

<mosaic_0001>
module attributes {stable_mosaic.version = 11 : i64} {
  func.func @dueling_dqn_kernel(%arg0: i32, %arg1: memref<8x8xf32, #tpu.memory_space<vmem>>, %arg2: memref<512x8xbf16, #tpu.memory_space<vmem>>, %arg3: memref<512x1xf32, #tpu.memory_space<vmem>>, %arg4: memref<8x512xbf16, #tpu.memory_space<vmem>>, %arg5: memref<8x1xf32, #tpu.memory_space<vmem>>, %arg6: memref<8x8xf32, #tpu.memory_space<vmem>>) attributes {dimension_semantics = [#tpu.dimension_semantics<parallel>], iteration_bounds = array<i64: 1>, scalar_prefetch = 0 : i64, scratch_operands = 0 : i64, tpu.core_type = #tpu.core_type<tc>, window_params = [{transform_indices = @transform_0, window_bounds = array<i64: 8, 8>}, {pipeline_mode = #tpu.pipeline_mode<synchronous>, transform_indices = @transform_1, window_bounds = array<i64: 512, 8>}, {pipeline_mode = #tpu.pipeline_mode<synchronous>, transform_indices = @transform_2, window_bounds = array<i64: 512, 1>}, {pipeline_mode = #tpu.pipeline_mode<synchronous>, transform_indices = @transform_3, window_bounds = array<i64: 8, 512>}, {pipeline_mode = #tpu.pipeline_mode<synchronous>, transform_indices = @transform_4, window_bounds = array<i64: 8, 1>}, {transform_indices = @transform_5, window_bounds = array<i64: 8, 8>}]} {
    %c0 = arith.constant 0 : index
    %c0_0 = arith.constant 0 : index
    %0 = vector.load %arg1[%c0, %c0_0] : memref<8x8xf32, #tpu.memory_space<vmem>>, vector<8x8xf32>
    %1 = arith.truncf %0 : vector<8x8xf32> to vector<8x8xbf16>
    %c0_1 = arith.constant 0 : index
    %c0_2 = arith.constant 0 : index
    %2 = vector.load %arg2[%c0_1, %c0_2] : memref<512x8xbf16, #tpu.memory_space<vmem>>, vector<512x8xbf16>
    %cst = arith.constant dense<0.000000e+00> : vector<512x8xf32>
    %3 = tpu.matmul %2, %1, %cst {dimension_numbers = #tpu.dot_dimension_numbers<[1], [1], [0], [0], [0, 0, 1, 0], [], []>} : vector<512x8xbf16>, vector<8x8xbf16>, vector<512x8xf32> -> vector<512x8xf32>
    %c0_3 = arith.constant 0 : index
    %c0_4 = arith.constant 0 : index
    %4 = vector.load %arg3[%c0_3, %c0_4] : memref<512x1xf32, #tpu.memory_space<vmem>>, vector<512x1xf32>
    %5 = vector.broadcast %4 : vector<512x1xf32> to vector<512x8xf32>
    %6 = arith.addf %3, %5 : vector<512x8xf32>
    %cst_5 = arith.constant 0.000000e+00 : f32
    %7 = vector.broadcast %cst_5 : f32 to vector<512x8xf32>
    %8 = arith.maximumf %6, %7 : vector<512x8xf32>
    %c0_6 = arith.constant 0 : index
    %c0_7 = arith.constant 0 : index
    %9 = vector.load %arg4[%c0_6, %c0_7] : memref<8x512xbf16, #tpu.memory_space<vmem>>, vector<8x512xbf16>
    %10 = arith.truncf %8 : vector<512x8xf32> to vector<512x8xbf16>
    %cst_8 = arith.constant dense<0.000000e+00> : vector<8x8xf32>
    %11 = tpu.matmul %9, %10, %cst_8 {dimension_numbers = #tpu.dot_dimension_numbers<[1], [0], [0], [1], [0, 0, 1, 1], [], []>} : vector<8x512xbf16>, vector<512x8xbf16>, vector<8x8xf32> -> vector<8x8xf32>
    %c0_9 = arith.constant 0 : index
    %c0_10 = arith.constant 0 : index
    %12 = vector.load %arg5[%c0_9, %c0_10] : memref<8x1xf32, #tpu.memory_space<vmem>>, vector<8x1xf32>
    %13 = vector.broadcast %12 : vector<8x1xf32> to vector<8x8xf32>
    %14 = arith.addf %11, %13 : vector<8x8xf32>
    %c0_11 = arith.constant 0 : index
    %c0_12 = arith.constant 0 : index
    %15 = vector.load %arg6[%c0_11, %c0_12] : memref<8x8xf32, #tpu.memory_space<vmem>>, vector<8x8xf32>
    tpu.vector_store %arg6[%c0_11, %c0_12], %14 {strides = array<i32>} : memref<8x8xf32, #tpu.memory_space<vmem>>, vector<8x8xf32>,
    return
  }
  func.func @transform_0(%arg0: i32) -> (i32, i32) {
    %c0_i32 = arith.constant 0 : i32
    %c0_i32_0 = arith.constant 0 : i32
    return %arg0, %c0_i32 : i32, i32
  }
  func.func @transform_1(%arg0: i32) -> (i32, i32) {
    %c0_i32 = arith.constant 0 : i32
    %c0_i32_0 = arith.constant 0 : i32
    %c0_i32_1 = arith.constant 0 : i32
    return %c0_i32, %c0_i32_0 : i32, i32
  }
  func.func @transform_2(%arg0: i32) -> (i32, i32) {
    %c0_i32 = arith.constant 0 : i32
    %c0_i32_0 = arith.constant 0 : i32
    %c0_i32_1 = arith.constant 0 : i32
    return %c0_i32, %c0_i32_0 : i32, i32
  }
  func.func @transform_3(%arg0: i32) -> (i32, i32) {
    %c0_i32 = arith.constant 0 : i32
    %c0_i32_0 = arith.constant 0 : i32
    %c0_i32_1 = arith.constant 0 : i32
    return %c0_i32, %c0_i32_0 : i32, i32
  }
  func.func @transform_4(%arg0: i32) -> (i32, i32) {
    %c0_i32 = arith.constant 0 : i32
    %c0_i32_0 = arith.constant 0 : i32
    %c0_i32_1 = arith.constant 0 : i32
    return %c0_i32, %c0_i32_0 : i32, i32
  }
  func.func @transform_5(%arg0: i32) -> (i32, i32) {
    %c0_i32 = arith.constant 0 : i32
    %c0_i32_0 = arith.constant 0 : i32
    return %c0_i32, %arg0 : i32, i32
  }
}

</mosaic_0001>

<bundles_post_ra>
// kernel: dueling_dqn_forward.1
= control target key start
LH: loop header
LB: loop body
LE: loop exit
PB: predicated region body
PF: predicated region fallthrough
CT: control target
= control target key end

     0   :  { %v1477_v0 = vmov 0   ;;  %vm631_vm0 = vcmask 64512   ;;  %s2123_s2 = inlined_call_operand.vmem [shape: f32[512,1], index: 2, kind: input, shape index: {}]   ;;  %s2124_s0 = inlined_call_operand.vmem [shape: f32[8,8], index: 0, kind: input, shape index: {}]   ;;  %s2125_s1 = inlined_call_operand.vmem [shape: bf16[512,8], index: 1, kind: input, shape index: {}]   ;;  %s2126_s4 = inlined_call_operand.vmem [shape: f32[8,1], index: 4, kind: input, shape index: {}]   ;;  %s2127_s3 = inlined_call_operand.vmem [shape: bf16[8,512], index: 3, kind: input, shape index: {}]   ;;  %s2128_s5 = inlined_call_operand.vmem [shape: f32[8,8], index: 5, kind: output, shape index: {}]  }
   0x1   :  { %1440 = vset.pattern.permute.xlu1 %v1477_v0  ;;  %1439 = vset.pattern.permute.xlu0 %v1477_v0  ;;  %v117_v1 = vld [vmem:[%s2123_s2 + $0xf0] sm:$0xff]  ;;  %v21_v3 = vld [vmem:[%s2124_s0] sm:$0xff]  ;;  %v118_v5 = vld [vmem:[%s2123_s2 + $0xf8] sm:$0xff] }
   0x2   :  { %v101_v2 = vld [vmem:[%s2123_s2 + $0x70] sm:$0xff]  ;;  %303 = vperm.xlu0 %1439, %v117_v1   ;;  %v22_v4 = vpack.c.bf16 %v21_v3, %v21_v3  ;;  %v102_v6 = vld [vmem:[%s2123_s2 + $0x78] sm:$0xff]  ;;  %v1441_v8 = vld [vmem:[%s2125_s1] sm:$0xff]  }
   0x3   :  { %223 = vperm.xlu1 %1440, %v101_v2   ;;  %v1442_v9 = vld [vmem:[%s2125_s1 + $0xb0] sm:$0xff]   ;;  %v115_v10 = vld [vmem:[%s2123_s2 + $0xe0] sm:$0xff]  ;;  %v116_v11 = vld [vmem:[%s2123_s2 + $0xe8] sm:$0xff]  ;;  %1370 = vmatprep.mubr.msk.bf16.mxu0 %vm631_vm0, %v1441_v8 }
   0x4   :  { %1436 = vmatprep.subr.msk.bf16.mxu0 %vm631_vm0, %v22_v4  ;;  %1437 = vmatprep.subr.msk.bf16.mxu1 %vm631_vm0, %v22_v4  ;;  %v729_v7 = vsel %vm631_vm0, %v22_v4, 0  ;;  %v1443_v12 = vld [vmem:[%s2125_s1 + $0x8] sm:$0xff]   ;;  %v1444_v13 = vld [vmem:[%s2125_s1 + $0xb8] sm:$0xff]   ;;  %v1445_v15 = vld [vmem:[%s2125_s1 + $0x10] sm:$0xff]  }
   0x5   :  { %1369 = vmatpush3.bf16.xpose.msra.mxu0 %v729_v7  ;;  %1435 = vmatpush3.bf16.xpose.msra.mxu1 %v729_v7  ;;  %v100_v14 = vld [vmem:[%s2123_s2 + $0x68] sm:$0xff]  ;;  %v1446_v16 = vld [vmem:[%s2125_s1 + $0xc0] sm:$0xff]   ;;  %v114_v18 = vld [vmem:[%s2123_s2 + $0xd8] sm:$0xff] }
   0x6   :  { %308 = vperm.xlu0 %1439, %v118_v5   ;;  %1414 = vmatprep.mubr.msk.bf16.mxu1 %vm631_vm0, %v1442_v9  ;;  %v99_v17 = vld [vmem:[%s2123_s2 + $0x60] sm:$0xff]  ;;  %v113_v19 = vld [vmem:[%s2123_s2 + $0xd0] sm:$0xff]  ;;  %v1447_v20 = vld [vmem:[%s2125_s1 + $0x18] sm:$0xff]  }
   0x7   :  { %228 = vperm.xlu1 %1440, %v102_v6   ;;  %v1448_v21 = vld [vmem:[%s2125_s1 + $0xc8] sm:$0xff]   ;;  %v1449_v22 = vld [vmem:[%s2125_s1 + $0x20] sm:$0xff]   ;;  %v1450_v23 = vld [vmem:[%s2125_s1 + $0xd0] sm:$0xff]  }
   0x8   :  { %v98_v24 = vld [vmem:[%s2123_s2 + $0x58] sm:$0xff]  ;;  %v97_v25 = vld [vmem:[%s2123_s2 + $0x50] sm:$0xff]  ;;  %v112_v26 = vld [vmem:[%s2123_s2 + $0xc8] sm:$0xff] }
   0x9   :  { %v111_v27 = vld [vmem:[%s2123_s2 + $0xc0] sm:$0xff]  ;;  %v1451_v28 = vld [vmem:[%s2125_s1 + $0x28] sm:$0xff]   ;;  %v1452_v29 = vld [vmem:[%s2125_s1 + $0xd8] sm:$0xff]  }
   0xa   :  { %293 = vperm.xlu0 %1439, %v115_v10   ;;  %v1453_v30 = vld [vmem:[%s2125_s1 + $0x30] sm:$0xff]   ;;  %v1454_v31 = vld [vmem:[%s2125_s1 + $0xe0] sm:$0xff]   ;;  %v96_v32 = vld [vmem:[%s2123_s2 + $0x48] sm:$0xff] }
   0xb   :  { %298 = vperm.xlu1 %1440, %v116_v11   ;;  %v95_v33 = vld [vmem:[%s2123_s2 + $0x40] sm:$0xff]  ;;  %v110_v34 = vld [vmem:[%s2123_s2 + $0xb8] sm:$0xff]  ;;  %v109_v35 = vld [vmem:[%s2123_s2 + $0xb0] sm:$0xff] }
   0xc   :  { %1371 = vmatmul.mubr.msk.bf16.vlgmr.msra.gmra.mxu0 %vm631_vm0, %v1443_v12  ;;  %1415 = vmatmul.mubr.msk.bf16.vlgmr.msra.gmra.mxu1 %vm631_vm0, %v1444_v13  ;;  %v1455_v36 = vld [vmem:[%s2125_s1 + $0x38] sm:$0xff]   ;;  %v1456_v37 = vld [vmem:[%s2125_s1 + $0xe8] sm:$0xff]   ;;  %v1457_v38 = vld [vmem:[%s2125_s1 + $0x40] sm:$0xff]  }
   0xd   :  { %1374 = vmatprep.mubr.msk.bf16.mxu0 %vm631_vm0, %v1445_v15  ;;  %1418 = vmatprep.mubr.msk.bf16.mxu1 %vm631_vm0, %v1446_v16  ;;  %v1458_v39 = vld [vmem:[%s2125_s1 + $0xf0] sm:$0xff]   ;;  %v94_v40 = vld [vmem:[%s2123_s2 + $0x38] sm:$0xff]  ;;  %v108_v42 = vld [vmem:[%s2123_s2 + $0xa8] sm:$0xff] }
   0xe   :  { %213 = vperm.xlu0 %1439, %v99_v17   ;;  %v93_v41 = vld [vmem:[%s2123_s2 + $0x30] sm:$0xff]  ;;  %v107_v43 = vld [vmem:[%s2123_s2 + $0xa0] sm:$0xff]  ;;  %v1459_v44 = vld [vmem:[%s2125_s1 + $0x48] sm:$0xff]  }
   0xf   :  { %218 = vperm.xlu1 %1440, %v100_v14   ;;  %v1460_v45 = vld [vmem:[%s2125_s1 + $0xf8] sm:$0xff]   ;;  %v1461_v46 = vld [vmem:[%s2125_s1 + $0x50] sm:$0xff]   ;;  %v92_v47 = vld [vmem:[%s2123_s2 + $0x28] sm:$0xff] }
  0x10   :  { %v91_v48 = vld [vmem:[%s2123_s2 + $0x20] sm:$0xff]  ;;  %v106_v49 = vld [vmem:[%s2123_s2 + $0x98] sm:$0xff]  ;;  %v105_v50 = vld [vmem:[%s2123_s2 + $0x90] sm:$0xff] }
  0x11   :  { %v1462_v51 = vld [vmem:[%s2125_s1 + $0x58] sm:$0xff]   ;;  %v1463_v52 = vld [vmem:[%s2125_s1 + $0x60] sm:$0xff]   ;;  %v89_v54 = vld [vmem:[%s2123_s2 + $0x10] sm:$0xff] }
  0x12   :  { %283 = vperm.xlu0 %1439, %v113_v19   ;;  %v90_v53 = vld [vmem:[%s2123_s2 + $0x18] sm:$0xff]  ;;  %v104_v55 = vld [vmem:[%s2123_s2 + $0x88] sm:$0xff]  ;;  %v103_v56 = vld [vmem:[%s2123_s2 + $0x80] sm:$0xff] }
  0x13   :  { %288 = vperm.xlu1 %1440, %v114_v18   ;;  %v1464_v57 = vld [vmem:[%s2125_s1 + $0x68] sm:$0xff]   ;;  %v1465_v58 = vld [vmem:[%s2125_s1 + $0x70] sm:$0xff]   ;;  %v87_v60 = vld [vmem:[%s2123_s2] sm:$0xff] }
  0x14   :  { %1375 = vmatmul.mubr.msk.bf16.gmra.mxu0 %vm631_vm0, %v1447_v20  ;;  %1419 = vmatmul.mubr.msk.bf16.gmra.mxu1 %vm631_vm0, %v1448_v21  ;;  %v88_v59 = vld [vmem:[%s2123_s2 + $0x8] sm:$0xff]  ;;  %v150_v61 = vld [vmem:[%s2123_s2 + $0x1f8] sm:$0xff]  ;;  %v149_v62 = vld [vmem:[%s2123_s2 + $0x1f0] sm:$0xff] }
  0x15   :  { %1378 = vmatprep.mubr.msk.bf16.mxu0 %vm631_vm0, %v1449_v22  ;;  %1422 = vmatprep.mubr.msk.bf16.mxu1 %vm631_vm0, %v1450_v23  ;;  %v1466_v63 = vld [vmem:[%s2125_s1 + $0x78] sm:$0xff]   ;;  %v1467_v0 = vld [vmem:[%s2125_s1 + $0x80] sm:$0xff]   ;;  %v133_v2 = vld [vmem:[%s2123_s2 + $0x170] sm:$0xff] }
  0x16   :  { %203 = vperm.xlu0 %1439, %v97_v25   ;;  %v134_v1 = vld [vmem:[%s2123_s2 + $0x178] sm:$0xff]  ;;  %v148_v3 = vld [vmem:[%s2123_s2 + $0x1e8] sm:$0xff]  ;;  %v147_v4 = vld [vmem:[%s2123_s2 + $0x1e0] sm:$0xff] }
  0x17   :  { %208 = vperm.xlu1 %1440, %v98_v24   ;;  %v1468_v5 = vld [vmem:[%s2125_s1 + $0x88] sm:$0xff]   ;;  %v1469_v6 = vld [vmem:[%s2125_s1 + $0x90] sm:$0xff]   ;;  %v131_v8 = vld [vmem:[%s2123_s2 + $0x160] sm:$0xff] }
  0x18   :  { %v132_v7 = vld [vmem:[%s2123_s2 + $0x168] sm:$0xff]  ;;  %v146_v9 = vld [vmem:[%s2123_s2 + $0x1d8] sm:$0xff]  ;;  %v145_v10 = vld [vmem:[%s2123_s2 + $0x1d0] sm:$0xff] }
  0x19   :  { %v1470_v11 = vld [vmem:[%s2125_s1 + $0x98] sm:$0xff]   ;;  %v1471_v12 = vld [vmem:[%s2125_s1 + $0xa0] sm:$0xff]   ;;  %v129_v14 = vld [vmem:[%s2123_s2 + $0x150] sm:$0xff] }
  0x1a   :  { %273 = vperm.xlu0 %1439, %v111_v27   ;;  %v130_v13 = vld [vmem:[%s2123_s2 + $0x158] sm:$0xff]  ;;  %v144_v15 = vld [vmem:[%s2123_s2 + $0x1c8] sm:$0xff]  ;;  %v143_v16 = vld [vmem:[%s2123_s2 + $0x1c0] sm:$0xff] }
  0x1b   :  { %278 = vperm.xlu1 %1440, %v112_v26   ;;  %v1472_v17 = vld [vmem:[%s2125_s1 + $0xa8] sm:$0xff]   ;;  %v127_v19 = vld [vmem:[%s2123_s2 + $0x140] sm:$0xff]  ;;  %v142_v20 = vld [vmem:[%s2123_s2 + $0x1b8] sm:$0xff] }
  0x1c   :  { %1379 = vmatmul.mubr.msk.bf16.gmra.mxu0 %vm631_vm0, %v1451_v28  ;;  %1423 = vmatmul.mubr.msk.bf16.gmra.mxu1 %vm631_vm0, %v1452_v29  ;;  %v128_v18 = vld [vmem:[%s2123_s2 + $0x148] sm:$0xff]  ;;  %v141_v21 = vld [vmem:[%s2123_s2 + $0x1b0] sm:$0xff]  ;;  %v126_v22 = vld [vmem:[%s2123_s2 + $0x138] sm:$0xff] }
  0x1d   :  { %1382 = vmatprep.mubr.msk.bf16.mxu0 %vm631_vm0, %v1453_v30  ;;  %1426 = vmatprep.mubr.msk.bf16.mxu1 %vm631_vm0, %v1454_v31  ;;  %v125_v23 = vld [vmem:[%s2123_s2 + $0x130] sm:$0xff]  ;;  %v140_v24 = vld [vmem:[%s2123_s2 + $0x1a8] sm:$0xff]  ;;  %v139_v25 = vld [vmem:[%s2123_s2 + $0x1a0] sm:$0xff] }
  0x1e   :  { %193 = vperm.xlu0 %1439, %v95_v33   ;;  %v124_v26 = vld [vmem:[%s2123_s2 + $0x128] sm:$0xff]  ;;  %v123_v27 = vld [vmem:[%s2123_s2 + $0x120] sm:$0xff]  ;;  %v138_v28 = vld [vmem:[%s2123_s2 + $0x198] sm:$0xff] }
  0x1f   :  { %198 = vperm.xlu1 %1440, %v96_v32   ;;  %v137_v29 = vld [vmem:[%s2123_s2 + $0x190] sm:$0xff]  ;;  %v122_v30 = vld [vmem:[%s2123_s2 + $0x118] sm:$0xff]  ;;  %v136_v32 = vld [vmem:[%s2123_s2 + $0x188] sm:$0xff] }
  0x20   :  { %v121_v31 = vld [vmem:[%s2123_s2 + $0x110] sm:$0xff]  ;;  %v135_v33 = vld [vmem:[%s2123_s2 + $0x180] sm:$0xff] }
  0x22   :  { %263 = vperm.xlu0 %1439, %v109_v35   ;;  %v119_v35 = vld [vmem:[%s2123_s2 + $0x100] sm:$0xff] }
  0x23   :  { %268 = vperm.xlu1 %1440, %v110_v34   ;;  %v120_v34 = vld [vmem:[%s2123_s2 + $0x108] sm:$0xff] }
  0x24   :  { %1383 = vmatmul.mubr.msk.bf16.gmra.mxu0 %vm631_vm0, %v1455_v36  ;;  %1427 = vmatmul.mubr.msk.bf16.gmra.mxu1 %vm631_vm0, %v1456_v37 }
  0x25   :  { %1386 = vmatprep.mubr.msk.bf16.mxu0 %vm631_vm0, %v1457_v38  ;;  %1430 = vmatprep.mubr.msk.bf16.mxu1 %vm631_vm0, %v1458_v39  ;;  %v1118_v38 = vld [vmem:[%s2126_s4] sm:$0xff] }
  0x26   :  { %183 = vperm.xlu0 %1439, %v93_v41  }
  0x27   :  { %188 = vperm.xlu1 %1440, %v94_v40  }
  0x2a   :  { %253 = vperm.xlu0 %1439, %v107_v43  }
  0x2b   :  { %258 = vperm.xlu1 %1440, %v108_v42  }
  0x2c   :  { %1387 = vmatmul.mubr.msk.bf16.gmra.mxu0 %vm631_vm0, %v1459_v44  ;;  %1431 = vmatmul.mubr.msk.bf16.gmra.mxu1 %vm631_vm0, %v1460_v45 }
  0x2d   :  { %1390 = vmatprep.mubr.msk.bf16.mxu0 %vm631_vm0, %v1461_v46 }
  0x2e   :  { %173 = vperm.xlu0 %1439, %v91_v48  }
  0x2f   :  { %178 = vperm.xlu1 %1440, %v92_v47  }
  0x32   :  { %243 = vperm.xlu0 %1439, %v105_v50  }
  0x33   :  { %248 = vperm.xlu1 %1440, %v106_v49  }
  0x34   :  { %1391 = vmatmul.mubr.msk.bf16.gmra.mxu0 %vm631_vm0, %v1462_v51 }
  0x35   :  { %1394 = vmatprep.mubr.msk.bf16.mxu0 %vm631_vm0, %v1463_v52 }
  0x36   :  { %163 = vperm.xlu0 %1439, %v89_v54  }
  0x37   :  { %168 = vperm.xlu1 %1440, %v90_v53  }
  0x3a   :  { %233 = vperm.xlu0 %1439, %v103_v56   ;;  %v1876_v56 = vld [vmem:[%s2127_s3] sm:$0xff] }
  0x3b   :  { %238 = vperm.xlu1 %1440, %v104_v55   ;;  %2130 = vst [vmem:[#allocation2_spill] sm:$0xff] %v1876_v56 }
  0x3c   :  { %1395 = vmatmul.mubr.msk.bf16.gmra.mxu0 %vm631_vm0, %v1464_v57  ;;  %v1288_v57 = vcombine.high %v1876_v56, %v1876_v56 }
  0x3d   :  { %1398 = vmatprep.mubr.msk.bf16.mxu0 %vm631_vm0, %v1465_v58 }
  0x3e   :  { %153 = vperm.xlu0 %1439, %v87_v60   ;;  %1170 = vmatprep.mubr.bf16.mxu1 %v1288_v57 }
  0x3f   :  { %158 = vperm.xlu1 %1440, %v88_v59  }
  0x42   :  { %463 = vperm.xlu0 %1439, %v149_v62  }
  0x43   :  { %468 = vperm.xlu1 %1440, %v150_v61  }
  0x44   :  { %1399 = vmatmul.mubr.msk.bf16.gmra.mxu0 %vm631_vm0, %v1466_v63 }
  0x45   :  { %1402 = vmatprep.mubr.msk.bf16.mxu0 %vm631_vm0, %v1467_v0 }
  0x46   :  { %383 = vperm.xlu0 %1439, %v133_v2  }
  0x47   :  { %388 = vperm.xlu1 %1440, %v134_v1  }
  0x4a   :  { %453 = vperm.xlu0 %1439, %v147_v4  }
  0x4b   :  { %458 = vperm.xlu1 %1440, %v148_v3  }
  0x4c   :  { %1403 = vmatmul.mubr.msk.bf16.gmra.mxu0 %vm631_vm0, %v1468_v5 }
  0x4d   :  { %1406 = vmatprep.mubr.msk.bf16.mxu0 %vm631_vm0, %v1469_v6 }
  0x4e   :  { %373 = vperm.xlu0 %1439, %v131_v8  }
  0x4f   :  { %378 = vperm.xlu1 %1440, %v132_v7  }
  0x52   :  { %443 = vperm.xlu0 %1439, %v145_v10  }
  0x53   :  { %448 = vperm.xlu1 %1440, %v146_v9  }
  0x54   :  { %1407 = vmatmul.mubr.msk.bf16.gmra.mxu0 %vm631_vm0, %v1470_v11 }
  0x55   :  { %1410 = vmatprep.mubr.msk.bf16.mxu0 %vm631_vm0, %v1471_v12 }
  0x56   :  { %363 = vperm.xlu0 %1439, %v129_v14  }
  0x57   :  { %368 = vperm.xlu1 %1440, %v130_v13  }
  0x5a   :  { %433 = vperm.xlu0 %1439, %v143_v16  }
  0x5b   :  { %438 = vperm.xlu1 %1440, %v144_v15  }
  0x5c   :  { %1411 = vmatmul.mubr.msk.bf16.gmra.mxu0 %vm631_vm0, %v1472_v17 }
  0x5e   :  { %353 = vperm.xlu0 %1439, %v127_v19  }
  0x5f   :  { %358 = vperm.xlu1 %1440, %v128_v18  }
  0x62   :  { %423 = vperm.xlu0 %1439, %v141_v21  }
  0x63   :  { %428 = vperm.xlu1 %1440, %v142_v20  }
  0x66   :  { %343 = vperm.xlu0 %1439, %v125_v23  }
  0x67   :  { %348 = vperm.xlu1 %1440, %v126_v22  }
  0x6a   :  { %413 = vperm.xlu0 %1439, %v139_v25  }
  0x6b   :  { %418 = vperm.xlu1 %1440, %v140_v24  }
  0x6e   :  { %333 = vperm.xlu0 %1439, %v123_v27  }
  0x6f   :  { %338 = vperm.xlu1 %1440, %v124_v26  }
  0x72   :  { %403 = vperm.xlu0 %1439, %v137_v29  }
  0x73   :  { %408 = vperm.xlu1 %1440, %v138_v28  }
  0x76   :  { %323 = vperm.xlu0 %1439, %v121_v31  }
  0x77   :  { %328 = vperm.xlu1 %1440, %v122_v30  }
  0x7a   :  { %393 = vperm.xlu0 %1439, %v135_v33  }
  0x7b   :  { %398 = vperm.xlu1 %1440, %v136_v32  }
  0x7d   :  { %v1834_v36 = vpop.permute.xlu0 %303 }
  0x7e   :  { %v1836_v37 = vpop.permute.xlu1 %223  ;;  %313 = vperm.xlu0 %1439, %v119_v35  }
  0x7f   :  { %318 = vperm.xlu1 %1440, %v120_v34  }
  0x81   :  { %v1841_v39 = vpop.permute.xlu0 %308 }
  0x82   :  { %v1843_v40 = vpop.permute.xlu1 %228  ;;  %1121 = vperm.xlu0 %1439, %v1118_v38  }
  0x85   :  { %v1845_v41 = vpop.permute.xlu0 %293 }
  0x86   :  { %v1847_v42 = vpop.permute.xlu1 %298 }
  0x89   :  { %v1849_v43 = vpop.permute.xlu0 %213 }
  0x8a   :  { %v1851_v44 = vpop.permute.xlu1 %218 }
  0x8d   :  { %v1853_v45 = vpop.permute.xlu0 %283 }
  0x8e   :  { %v1855_v46 = vpop.permute.xlu1 %288 }
  0x91   :  { %v1857_v47 = vpop.permute.xlu0 %203 }
  0x92   :  { %v1859_v48 = vpop.permute.xlu1 %208 }
  0x95   :  { %v1861_v49 = vpop.permute.xlu0 %273 }
  0x96   :  { %v1863_v50 = vpop.permute.xlu1 %278 }
  0x99   :  { %v1865_v51 = vpop.permute.xlu0 %193 }
  0x9a   :  { %v1867_v52 = vpop.permute.xlu1 %198 }
  0x9d   :  { %v1869_v53 = vpop.permute.xlu0 %263 }
  0x9e   :  { %v1871_v54 = vpop.permute.xlu1 %268 }
  0xa1   :  { %v184_v55 = vpop.permute.xlu0 %183 }
  0xa2   :  { %v189_v58 = vpop.permute.xlu1 %188 }
  0xa5   :  { %v1880_v59 = vpop.permute.xlu0 %253 }
  0xa6   :  { %v1882_v60 = vpop.permute.xlu1 %258 }
  0xa9   :  { %v174_v61 = vpop.permute.xlu0 %173 }
  0xaa   :  { %v179_v62 = vpop.permute.xlu1 %178 }
  0xad   :  { %v1884_v63 = vpop.permute.xlu0 %243 }
  0xae   :  { %v1886_v0 = vpop.permute.xlu1 %248 }
  0xb1   :  { %v164_v1 = vpop.permute.xlu0 %163 }
  0xb2   :  { %v169_v2 = vpop.permute.xlu1 %168 }
  0xb5   :  { %v1888_v3 = vpop.permute.xlu0 %233 }
  0xb6   :  { %v1890_v4 = vpop.permute.xlu1 %238 }
  0xb9   :  { %v154_v8 = vpop.permute.xlu0 %153 }
  0xba   :  { %v159_v12 = vpop.permute.xlu1 %158 }
  0xcc   :  { %v1372_v5 = vpop.f32.mrf.mxu0  ;;  %v1896_v24 = vpop.f32.mrf.mxu1 }
  0xcd   :  { %v774_v7 = vadd.f32 %v1372_v5, %v164_v1  ;;  %2133 = vst [vmem:[#allocation5_spill] sm:$0xff] %v1896_v24 }
  0xce   :  { %v765_v6 = vpop.f32.mrf.mxu0  ;;  %v1898_v32 = vpop.f32.mrf.mxu1 }
  0xcf   :  { %v766_v10 = vadd.f32 %v765_v6, %v154_v8  ;;  %v1022_v14 = vmax.f32 %v774_v7, 0.0  ;;  %2134 = vst [vmem:[#allocation6_spill] sm:$0xff] %v1898_v32  ;;  %v1916_v6 = vpop.permute.xlu1 %468  ;;  %v1918_v7 = vpop.permute.xlu0 %463 }
  0xd0   :  { %v1373_v9 = vpop.f32.mrf.mxu0  ;;  %v1908_v1 = vpop.f32.mrf.mxu1 }
  0xd1   :  { %v777_v11 = vadd.f32 %v1373_v9, %v169_v2  ;;  %v1020_v18 = vmax.f32 %v766_v10, 0.0 }
  0xd2   :  { %v768_v13 = vpop.f32.mrf.mxu0  ;;  %v1914_v2 = vpop.f32.mrf.mxu1 }
  0xd3   :  { %v1023_v15 = vmax.f32 %v777_v11, 0.0  ;;  %v769_v16 = vadd.f32 %v768_v13, %v159_v12  ;;  %2135 = vst [vmem:[#allocation7_spill] sm:$0xff] %v1914_v2  ;;  %v1926_v13 = vpop.permute.xlu1 %388 }
  0xd4   :  { %v1376_v17 = vpop.f32.mrf.mxu0  ;;  %v1920_v8 = vpop.f32.mrf.mxu1 }
  0xd5   :  { %v1892_v19 = vpack.c.bf16 %v1023_v15, %v1022_v14  ;;  %v1021_v20 = vmax.f32 %v769_v16, 0.0  ;;  %v790_v23 = vadd.f32 %v1376_v17, %v184_v55  ;;  %2136 = vst [vmem:[#allocation8_spill] sm:$0xff] %v1920_v8  ;;  %v1928_v14 = vpop.permute.xlu0 %383 }
  0xd6   :  { %v781_v21 = vpop.f32.mrf.mxu0  ;;  %v1922_v11 = vpop.f32.mrf.mxu1  ;;  %2138 = vst [vmem:[#allocation10_spill] sm:$0xff] %v1928_v14 }
  0xd7   :  { %2131 = vst [vmem:[#allocation3_spill] sm:$0xff] %v1892_v19  ;;  %v1894_v22 = vpack.c.bf16 %v1021_v20, %v1020_v18  ;;  %v782_v26 = vadd.f32 %v781_v21, %v174_v61  ;;  %v1026_v29 = vmax.f32 %v790_v23, 0.0  ;;  %2137 = vst [vmem:[#allocation9_spill] sm:$0xff] %v1922_v11  ;;  %v1938_v20 = vpop.permute.xlu1 %458 }
  0xd8   :  { %v1377_v25 = vpop.f32.mrf.mxu0  ;;  %v1932_v16 = vpop.f32.mrf.mxu1  ;;  %2140 = vst [vmem:[#allocation12_spill] sm:$0xff] %v1938_v20 }
  0xd9   :  { %2132 = vst [vmem:[#allocation4_spill] sm:$0xff] %v1894_v22  ;;  %v793_v27 = vadd.f32 %v1377_v25, %v189_v58  ;;  %v1024_v34 = vmax.f32 %v782_v26, 0.0  ;;  %2139 = vst [vmem:[#allocation11_spill] sm:$0xff] %v1932_v16  ;;  %v1940_v21 = vpop.permute.xlu0 %453 }
  0xda   :  { %v784_v28 = vpop.f32.mrf.mxu0  ;;  %2141 = vst [vmem:[#allocation13_spill] sm:$0xff] %v1940_v21  ;;  %v1942_v23 = vpop.f32.mrf.mxu1 }
  0xdb   :  { %v1027_v30 = vmax.f32 %v793_v27, 0.0  ;;  %v785_v31 = vadd.f32 %v784_v28, %v179_v62  ;;  %2142 = vst [vmem:[#allocation14_spill] sm:$0xff] %v1942_v23 }
  0xdc   :  { %v1900_v33 = vpop.f32.mrf.mxu0  ;;  %v1948_v27 = vpop.f32.mrf.mxu1 }
  0xdd   :  { %v1902_v35 = vpack.c.bf16 %v1027_v30, %v1026_v29  ;;  %v1025_v38 = vmax.f32 %v785_v31, 0.0  ;;  %2143 = vst [vmem:[#allocation15_spill] sm:$0xff] %v1948_v27  ;;  %v1952_v29 = vpop.permute.xlu1 %378  ;;  %v1954_v30 = vpop.permute.xlu0 %373 }
  0xde   :  { %v1904_v57 = vpop.f32.mrf.mxu0  ;;  %2144 = vst [vmem:[#allocation16_spill] sm:$0xff] %v1952_v29  ;;  %2145 = vst [vmem:[#allocation17_spill] sm:$0xff] %v1954_v30 }
  0xdf   :  { %v1906_v55 = vpack.c.bf16 %v1025_v38, %v1024_v34  ;;  %v1958_v34 = vpop.f32.mrf.mxu1 }
  0xe0   :  { %v1910_v61 = vpop.f32.mrf.mxu0  ;;  %2146 = vst [vmem:[#allocation18_spill] sm:$0xff] %v1958_v34 }
  0xe1   :  { %v1960_v8 = vpop.permute.xlu1 %448  ;;  %v1962_v23 = vpop.permute.xlu0 %443 }
  0xe2   :  { %v1912_v58 = vpop.f32.mrf.mxu0  ;;  %2147 = vst [vmem:[#allocation19_spill] sm:$0xff] %v1960_v8  ;;  %2148 = vst [vmem:[#allocation20_spill] sm:$0xff] %v1962_v23  ;;  %v1964_v16 = vpop.f32.mrf.mxu1 }
  0xe3   :  { %2149 = vst [vmem:[#allocation21_spill] sm:$0xff] %v1964_v16 }
  0xe4   :  { %v1384_v62 = vpop.f32.mrf.mxu0  ;;  %v1966_v32 = vpop.f32.mrf.mxu1 }
  0xe5   :  { %2150 = vst [vmem:[#allocation22_spill] sm:$0xff] %v1966_v32  ;;  %v1968_v2 = vpop.permute.xlu1 %368  ;;  %v1970_v30 = vpop.permute.xlu0 %363  ;;  %v822_v8 = vadd.f32 %v1384_v62, %v1836_v37 }
  0xe6   :  { %v813_v5 = vpop.f32.mrf.mxu0  ;;  %2151 = vst [vmem:[#allocation23_spill] sm:$0xff] %v1968_v2  ;;  %2152 = vst [vmem:[#allocation24_spill] sm:$0xff] %v1970_v30  ;;  %v1975_v19 = vpop.f32.mrf.mxu1 }
  0xe7   :  { %v1034_v62 = vmax.f32 %v822_v8, 0.0 }
  0xe8   :  { %v1385_v9 = vpop.f32.mrf.mxu0 }
  0xe9   :  { %v825_v29 = vadd.f32 %v1385_v9, %v1843_v40  ;;  %v1980_v20 = vpop.permute.xlu1 %438  ;;  %v1982_v30 = vpop.permute.xlu0 %433  ;;  %v814_v9 = vadd.f32 %v813_v5, %v1849_v43  ;;  %v806_v5 = vadd.f32 %v1900_v33, %v1857_v47 }
  0xea   :  { %v816_v10 = vpop.f32.mrf.mxu0 }
  0xeb   :  { %v1035_v32 = vmax.f32 %v825_v29, 0.0  ;;  %v817_v14 = vadd.f32 %v816_v10, %v1851_v44  ;;  %v1032_v8 = vmax.f32 %v814_v9, 0.0 }
  0xec   :  { %v1924_v12 = vpop.f32.mrf.mxu0 }
  0xee   :  { %v1930_v15 = vpop.f32.mrf.mxu0 }
  0xf0   :  { %v1934_v17 = vpop.f32.mrf.mxu0 }
  0xf2   :  { %v1936_v18 = vpop.f32.mrf.mxu0 }
  0xf4   :  { %v1944_v25 = vpop.f32.mrf.mxu0 }
  0xf6   :  { %v1946_v26 = vpop.f32.mrf.mxu0 }
  0xf8   :  { %v1950_v28 = vpop.f32.mrf.mxu0 }
  0xf9   :  { %v857_v33 = vadd.f32 %v1950_v28, %v1871_v54 }
  0xfa   :  { %v1956_v31 = vpop.f32.mrf.mxu0 }
  0xfb   :  { %v1043_v54 = vmax.f32 %v857_v33, 0.0  ;;  %v849_v28 = vadd.f32 %v1956_v31, %v1882_v60 }
  0xfc   :  { %v1396_v38 = vpop.f32.mrf.mxu0 }
  0xfd   :  { %v870_v44 = vadd.f32 %v1396_v38, %v1853_v45 }
  0xfe   :  { %v861_v11 = vpop.f32.mrf.mxu0 }
 0x100   :  { %v1397_v22 = vpop.f32.mrf.mxu0 }
 0x101   :  { %v873_v40 = vadd.f32 %v1397_v22, %v1855_v46  ;;  %v1093_v46 = vpack.c.bf16 %v1035_v32, %v1034_v62  ;;  %v1033_v22 = vmax.f32 %v817_v14, 0.0  ;;  %v862_v32 = vadd.f32 %v861_v11, %v1861_v49 }
 0x102   :  { %v864_v27 = vpop.f32.mrf.mxu0  ;;  %v801_v14 = vadd.f32 %v1912_v58, %v1867_v52  ;;  %v854_v52 = vadd.f32 %v1944_v25, %v1869_v53  ;;  %v846_v53 = vadd.f32 %v1946_v26, %v1880_v59  ;;  %v833_v26 = vadd.f32 %v1936_v18, %v1890_v4 }
 0x103   :  { %v1044_v58 = vmax.f32 %v862_v32, 0.0  ;;  %v830_v32 = vadd.f32 %v1930_v15, %v1888_v3  ;;  %v953_v3 = vadd.f32 %v1908_v1, %v1926_v13  ;;  %v2068_v1 = vld [vmem:[%s2127_s3 + $0x8] sm:$0xff] }
 0x104   :  { %v1400_v56 = vpop.f32.mrf.mxu0  ;;  %v1029_v62 = vmax.f32 %v801_v14, 0.0  ;;  %v1037_v14 = vmax.f32 %v833_v26, 0.0 }
 0x105   :  { %v886_v21 = vadd.f32 %v1400_v56, %v1834_v36  ;;  %v1067_v13 = vmax.f32 %v953_v3, 0.0 }
 0x106   :  { %v877_v34 = vpop.f32.mrf.mxu0 }
 0x107   :  { %v878_v16 = vadd.f32 %v877_v34, %v1845_v41  ;;  %v1050_v36 = vmax.f32 %v886_v21, 0.0  ;;  %v1987_v41 = vpop.f32.mrf.mxu1  ;;  %v809_v34 = vadd.f32 %v1910_v61, %v1859_v48  ;;  %v2003_v21 = vpop.permute.xlu1 %358  ;;  %v1046_v48 = vmax.f32 %v870_v44, 0.0 }
 0x108   :  { %v1401_v23 = vpop.f32.mrf.mxu0  ;;  %v2006_v61 = vpop.permute.xlu0 %353 }
 0x109   :  { %v889_v24 = vadd.f32 %v1401_v23, %v1841_v39  ;;  %v1048_v10 = vmax.f32 %v878_v16, 0.0  ;;  %v1999_v45 = vpop.f32.mrf.mxu1 }
 0x10a   :  { %v880_v2 = vpop.f32.mrf.mxu0 }
 0x10b   :  { %v1051_v56 = vmax.f32 %v889_v24, 0.0  ;;  %v881_v37 = vadd.f32 %v880_v2, %v1847_v42  ;;  %v1047_v42 = vmax.f32 %v873_v40, 0.0  ;;  %v865_v2 = vadd.f32 %v864_v27, %v1863_v50  ;;  %v2016_v49 = vpop.f32.mrf.mxu1  ;;  %v2022_v9 = vpop.permute.xlu1 %428 }
 0x10c   :  { %v1989_v39 = vpop.f32.mrf.mxu0  ;;  %v1031_v50 = vmax.f32 %v809_v34, 0.0  ;;  %v1092_v27 = vpack.c.bf16 %v1033_v22, %v1032_v8  ;;  %v841_v34 = vadd.f32 %v1934_v17, %v1886_v0  ;;  %v1041_v22 = vmax.f32 %v849_v28, 0.0  ;;  %v2158_v28 = vld [vmem:[#allocation16_spill] sm:$0xff] }
 0x10d   :  { %v1101_v23 = vpack.c.bf16 %v1051_v56, %v1050_v36  ;;  %v1049_v29 = vmax.f32 %v881_v37, 0.0  ;;  %v1099_v38 = vpack.c.bf16 %v1047_v42, %v1046_v48  ;;  %v1045_v40 = vmax.f32 %v865_v2, 0.0 }
 0x10e   :  { %v1994_v24 = vpop.f32.mrf.mxu0  ;;  %v1030_v36 = vmax.f32 %v806_v5, 0.0  ;;  %v798_v56 = vadd.f32 %v1904_v57, %v1865_v51  ;;  %v2028_v57 = vpop.permute.xlu0 %423  ;;  %v838_v2 = vadd.f32 %v1924_v12, %v1884_v63  ;;  %v1039_v59 = vmax.f32 %v841_v34, 0.0 }
 0x10f   :  { %v1100_v43 = vpack.c.bf16 %v1049_v29, %v1048_v10  ;;  %1324 = vmatprep.subr.bf16.mxu1 %v1101_v23  ;;  %v1098_v44 = vpack.c.bf16 %v1045_v40, %v1044_v58  ;;  %v1432_v23 = vpop.f32.mrf.mxu1  ;;  %v1042_v29 = vmax.f32 %v854_v52, 0.0  ;;  %v2036_v42 = vpop.permute.xlu1 %348  ;;  %v2153_v40 = vld [vmem:[#allocation12_spill] sm:$0xff]  ;;  %v2155_v52 = vld [vmem:[#allocation5_spill] sm:$0xff] }
 0x110   :  { %v2001_v16 = vpop.f32.mrf.mxu0  ;;  %1325 = vmatpush3.bf16.msra.mxu1 %v1093_v46  ;;  %v1091_v37 = vpack.c.bf16 %v1031_v50, %v1030_v36  ;;  %v1028_v10 = vmax.f32 %v798_v56, 0.0  ;;  %v1038_v48 = vmax.f32 %v838_v2, 0.0  ;;  %v1014_v18 = vadd.f32 %v1432_v23, %v1918_v7 }
 0x111   :  { %1326 = vmatprep.subr.bf16.mxu1 %v1100_v43  ;;  %v1097_v46 = vpack.c.bf16 %v1043_v54, %v1042_v29  ;;  %v1005_v31 = vpop.f32.mrf.mxu1  ;;  %v1040_v43 = vmax.f32 %v846_v53, 0.0  ;;  %v2157_v54 = vld [vmem:[#allocation13_spill] sm:$0xff]  ;;  %v2160_v29 = vld [vmem:[#allocation19_spill] sm:$0xff] }
 0x112   :  { %v2010_v47 = vpop.f32.mrf.mxu0  ;;  %v1090_v25 = vpack.c.bf16 %v1029_v62, %v1028_v10  ;;  %v2040_v5 = vpop.permute.xlu0 %343  ;;  %v1095_v12 = vpack.c.bf16 %v1039_v59, %v1038_v48  ;;  %v1006_v7 = vadd.f32 %v1005_v31, %v2157_v54  ;;  %v1001_v53 = vadd.f32 %v1999_v45, %v2160_v29  ;;  %v2163_v59 = vld [vmem:[#allocation6_spill] sm:$0xff]  ;;  %v2165_v48 = vld [vmem:[#allocation20_spill] sm:$0xff] }
 0x113   :  { %v1096_v0 = vpack.c.bf16 %v1041_v22, %v1040_v43  ;;  %v1433_v8 = vpop.f32.mrf.mxu1  ;;  %v2049_v63 = vpop.permute.xlu1 %418  ;;  %v2161_v22 = vld [vmem:[#allocation2_spill] sm:$0xff]  ;;  %v2162_v43 = vld [vmem:[#allocation17_spill] sm:$0xff] }
 0x114   :  { %v2018_v11 = vpop.f32.mrf.mxu0  ;;  %1327 = vmatpush3.bf16.msra.mxu1 %v1092_v27  ;;  %v1017_v50 = vadd.f32 %v1433_v8, %v1916_v6  ;;  %v2154_v6 = vld [vmem:[#allocation10_spill] sm:$0xff]  ;;  %v1287_v31 = vcombine.low %v2161_v22, %v2161_v22  ;;  %v942_v26 = vadd.f32 %v2163_v59, %v2162_v43  ;;  %v1290_v8 = vcombine.high %v2068_v1, %v2068_v1 }
 0x115   :  { %1328 = vmatprep.subr.bf16.mxu1 %v1099_v38  ;;  %v1008_v4 = vpop.f32.mrf.mxu1  ;;  %v950_v58 = vadd.f32 %v2155_v52, %v2154_v6  ;;  %v2167_v6 = vld [vmem:[#allocation24_spill] sm:$0xff]  ;;  %v2170_v29 = vld [vmem:[#allocation22_spill] sm:$0xff] }
 0x116   :  { %v2026_v51 = vpop.f32.mrf.mxu0  ;;  %v2052_v33 = vpop.permute.xlu0 %413  ;;  %v1083_v15 = vmax.f32 %v1017_v50, 0.0  ;;  %v1009_v36 = vadd.f32 %v1008_v4, %v2153_v40  ;;  %v1064_v40 = vmax.f32 %v942_v26, 0.0 }
 0x117   :  { %v2062_v62 = vpop.permute.xlu1 %338  ;;  %v1066_v2 = vmax.f32 %v950_v58, 0.0  ;;  %v990_v58 = vadd.f32 %v1987_v41, %v1982_v30  ;;  %v977_v30 = vadd.f32 %v2170_v29, %v2049_v63 }
 0x118   :  { %1329 = vmatpush3.bf16.msra.mxu1 %v1091_v37  ;;  %v2034_v60 = vpop.f32.mrf.mxu0  ;;  %v2156_v37 = vld [vmem:[#allocation3_spill] sm:$0xff]  ;;  %v1081_v34 = vmax.f32 %v1009_v36, 0.0 }
 0x119   :  { %1330 = vmatprep.subr.bf16.mxu1 %v1098_v44  ;;  %v2159_v44 = vld [vmem:[#allocation7_spill] sm:$0xff]  ;;  %v1109_v45 = vpack.c.bf16 %v1067_v13, %v1066_v2  ;;  %v1076_v41 = vmax.f32 %v990_v58, 0.0  ;;  %v1073_v2 = vmax.f32 %v977_v30, 0.0 }
 0x11a   :  { %v2044_v17 = vpop.f32.mrf.mxu0  ;;  %v945_v10 = vadd.f32 %v2159_v44, %v2158_v28  ;;  %v2072_v23 = vpop.permute.xlu0 %333 }
 0x11b   :  { %v409_v3 = vpop.permute.xlu1 %408 }
 0x11c   :  { %1331 = vmatpush3.bf16.msra.mxu1 %v1090_v25  ;;  %v1412_v27 = vpop.f32.mrf.mxu0  ;;  %v1065_v50 = vmax.f32 %v945_v10, 0.0 }
 0x11d   :  { %1332 = vmatprep.subr.bf16.mxu1 %v1097_v46  ;;  %v934_v52 = vadd.f32 %v1412_v27, %v2167_v6  ;;  %v2169_v27 = vld [vmem:[#allocation15_spill] sm:$0xff] }
 0x11e   :  { %v925_v56 = vpop.f32.mrf.mxu0  ;;  %v404_v36 = vpop.permute.xlu0 %403  ;;  %v982_v10 = vadd.f32 %v2169_v27, %v2028_v57  ;;  %v918_v57 = vadd.f32 %v2018_v11, %v2040_v5  ;;  %v910_v11 = vadd.f32 %v2026_v51, %v2072_v23 }
 0x11f   :  { %v1062_v28 = vmax.f32 %v934_v52, 0.0  ;;  %v926_v44 = vadd.f32 %v925_v56, %v2006_v61 }
 0x120   :  { %1333 = vmatpush3.bf16.msra.mxu1 %v1902_v35  ;;  %v1036_v35 = vmax.f32 %v830_v32, 0.0  ;;  %v1413_v46 = vpop.f32.mrf.mxu0  ;;  %v998_v32 = vadd.f32 %v1975_v19, %v2165_v48  ;;  %v1074_v63 = vmax.f32 %v982_v10, 0.0 }
 0x121   :  { %1334 = vmatprep.subr.bf16.mxu1 %v1096_v0  ;;  %v2164_v0 = vld [vmem:[#allocation4_spill] sm:$0xff] }
 0x122   :  { %v1094_v38 = vpack.c.bf16 %v1037_v14, %v1036_v35  ;;  %v2166_v14 = vld [vmem:[#allocation23_spill] sm:$0xff]  ;;  %v993_v35 = vadd.f32 %v2016_v49, %v1980_v20  ;;  %v1078_v19 = vmax.f32 %v998_v32, 0.0  ;;  %v2168_v20 = vld [vmem:[#allocation21_spill] sm:$0xff] }
 0x123   :  { %v937_v4 = vadd.f32 %v1413_v46, %v2166_v14  ;;  %v985_v49 = vadd.f32 %v2168_v20, %v2022_v9  ;;  %v921_v9 = vadd.f32 %v2034_v60, %v2036_v42  ;;  %v2172_v60 = vld [vmem:[#allocation11_spill] sm:$0xff] }
 0x124   :  { %1335 = vmatpush3.bf16.msra.mxu1 %v1906_v55  ;;  %v1082_v55 = vmax.f32 %v1014_v18, 0.0  ;;  %v1079_v18 = vmax.f32 %v1001_v53, 0.0  ;;  %v1077_v13 = vmax.f32 %v993_v35, 0.0  ;;  %v329_v53 = vpop.permute.xlu1 %328  ;;  %v969_v42 = vadd.f32 %v2172_v60, %v409_v3  ;;  %v2175_v3 = vld [vmem:[#allocation9_spill] sm:$0xff] }
 0x125   :  { %1336 = vmatprep.subr.bf16.mxu1 %v1095_v12  ;;  %v1080_v12 = vmax.f32 %v1006_v7, 0.0  ;;  %v1075_v61 = vmax.f32 %v985_v49, 0.0  ;;  %v1059_v59 = vmax.f32 %v921_v9, 0.0 }
 0x126   :  { %v1117_v25 = vpack.c.bf16 %v1083_v15, %v1082_v55  ;;  %v1063_v55 = vmax.f32 %v937_v4, 0.0  ;;  %v1115_v7 = vpack.c.bf16 %v1079_v18, %v1078_v19  ;;  %v1114_v56 = vpack.c.bf16 %v1077_v13, %v1076_v41  ;;  %v2174_v18 = vld [vmem:[#allocation14_spill] sm:$0xff] }
 0x127   :  { %v1116_v15 = vpack.c.bf16 %v1081_v34, %v1080_v12  ;;  %v324_v34 = vpop.permute.xlu0 %323 }
 0x128   :  { %1337 = vmatpush3.bf16.msra.mxu1 %v2156_v37  ;;  %v1108_v37 = vpack.c.bf16 %v1065_v50, %v1064_v40  ;;  %v1107_v46 = vpack.c.bf16 %v1063_v55, %v1062_v28  ;;  %v399_v32 = vpop.permute.xlu1 %398  ;;  %v905_v50 = vadd.f32 %v2001_v16, %v329_v53  ;;  %v1056_v40 = vmax.f32 %v910_v11, 0.0 }
 0x129   :  { %1338 = vmatprep.subr.bf16.mxu1 %v1094_v38  ;;  %v928_v38 = vpop.f32.mrf.mxu0  ;;  %v961_v35 = vadd.f32 %v2174_v18, %v399_v32 }
 0x12a   :  { %v929_v54 = vadd.f32 %v928_v38, %v2003_v21  ;;  %v2171_v21 = vld [vmem:[#allocation18_spill] sm:$0xff]  ;;  %v902_v38 = vadd.f32 %v1989_v39, %v324_v34  ;;  %v1055_v51 = vmax.f32 %v905_v50, 0.0 }
 0x12b   :  { %v394_v12 = vpop.permute.xlu0 %393  ;;  %v1069_v16 = vmax.f32 %v961_v35, 0.0 }
 0x12c   :  { %1339 = vmatpush3.bf16.msra.mxu1 %v2164_v0  ;;  %v1061_v22 = vmax.f32 %v929_v54, 0.0  ;;  %v1113_v0 = vpack.c.bf16 %v1075_v61, %v1074_v63 }
 0x12d   :  { %1346 = vmatprep.subr.bf16.mxu1 %v1117_v25  ;;  %v974_v25 = vadd.f32 %v2171_v21, %v2052_v33  ;;  %v913_v33 = vadd.f32 %v2044_v17, %v2062_v62  ;;  %v1071_v17 = vmax.f32 %v969_v42, 0.0 }
 0x12f   :  { %1171 = vmatmul.mubr.bf16.vlgmr.msra.gmra.mxu1 %v1287_v31  ;;  %v1060_v31 = vmax.f32 %v926_v44, 0.0  ;;  %v1072_v43 = vmax.f32 %v974_v25, 0.0  ;;  %v1057_v4 = vmax.f32 %v913_v33, 0.0  ;;  %v314_v58 = vpop.permute.xlu0 %313 }
 0x130   :  { %1347 = vmatpush3.bf16.msra.mxu1 %v1109_v45  ;;  %1210 = vmatprep.mubr.bf16.mxu1 %v1290_v8  ;;  %v2173_v8 = vld [vmem:[#allocation8_spill] sm:$0xff]  ;;  %v1058_v45 = vmax.f32 %v918_v57, 0.0  ;;  %v894_v55 = vadd.f32 %v1994_v24, %v314_v58 }
 0x131   :  { %1348 = vmatprep.subr.bf16.mxu1 %v1116_v15  ;;  %v1106_v26 = vpack.c.bf16 %v1061_v22, %v1060_v31  ;;  %v966_v48 = vadd.f32 %v2173_v8, %v404_v36  ;;  %v1112_v5 = vpack.c.bf16 %v1073_v2, %v1072_v43  ;;  %v958_v15 = vadd.f32 %v2175_v3, %v394_v12  ;;  %v319_v36 = vpop.permute.xlu1 %318 }
 0x132   :  { %v1105_v14 = vpack.c.bf16 %v1059_v59, %v1058_v45  ;;  %v897_v23 = vadd.f32 %v2010_v47, %v319_v36  ;;  %v1104_v6 = vpack.c.bf16 %v1057_v4, %v1056_v40  ;;  %v1052_v49 = vmax.f32 %v894_v55, 0.0 }
 0x133   :  { %v1070_v62 = vmax.f32 %v966_v48, 0.0  ;;  %v1068_v19 = vmax.f32 %v958_v15, 0.0  ;;  %v1289_v47 = vcombine.low %v2068_v1, %v2068_v1  ;;  %v1122_v29 = vpop.permute.xlu0 %1121 }
 0x134   :  { %1349 = vmatpush3.bf16.msra.mxu1 %v1108_v37  ;;  %v1054_v37 = vmax.f32 %v902_v38, 0.0  ;;  %v1053_v20 = vmax.f32 %v897_v23, 0.0 }
 0x135   :  { %1350 = vmatprep.subr.bf16.mxu1 %v1115_v7  ;;  %v1111_v52 = vpack.c.bf16 %v1071_v17, %v1070_v62  ;;  %v1110_v39 = vpack.c.bf16 %v1069_v16, %v1068_v19 }
 0x136   :  { %v1103_v54 = vpack.c.bf16 %v1055_v51, %v1054_v37  ;;  %v1102_v7 = vpack.c.bf16 %v1053_v20, %v1052_v49 }
 0x138   :  { %1351 = vmatpush3.bf16.msra.mxu1 %v1107_v46 }
 0x139   :  { %1352 = vmatprep.subr.bf16.mxu1 %v1114_v56 }
 0x13c   :  { %1353 = vmatpush3.bf16.msra.mxu1 %v1106_v26 }
 0x13d   :  { %1354 = vmatprep.subr.bf16.mxu1 %v1113_v0 }
 0x140   :  { %1355 = vmatpush3.bf16.msra.mxu1 %v1105_v14 }
 0x141   :  { %1356 = vmatprep.subr.bf16.mxu1 %v1112_v5 }
 0x144   :  { %1357 = vmatpush3.bf16.msra.mxu1 %v1104_v6 }
 0x145   :  { %1358 = vmatprep.subr.bf16.mxu1 %v1111_v52 }
 0x148   :  { %1359 = vmatpush3.bf16.msra.mxu1 %v1103_v54 }
 0x149   :  { %1360 = vmatprep.subr.bf16.mxu1 %v1110_v39 }
 0x14c   :  { %1361 = vmatpush3.bf16.msra.mxu1 %v1102_v7 }
 0x14f   :  { %1211 = vmatmul.mubr.bf16.vlgmr.msra.gmra.mxu1 %v1289_v47 }
 0x1ef   :  { %v1340_v13 = vpop.f32.mrf.mxu1 }
 0x1f1   :  { %v1341_v28 = vpop.f32.mrf.mxu1 }
 0x1f2   :  { %v1342_v10 = vadd.f32 %v1341_v28, %v1340_v13 }
 0x1f3   :  { %v1343_v44 = vpop.f32.mrf.mxu1 }
 0x1f4   :  { %v1173_v41 = vadd.f32 %v1342_v10, %v1122_v29 }
 0x1f5   :  { %v1344_v27 = vpop.f32.mrf.mxu1 }
 0x20f   :  { %v1362_v24 = vpop.f32.mrf.mxu1 }
 0x211   :  { %v1363_v30 = vpop.f32.mrf.mxu1 }
 0x212   :  { %v1364_v53 = vadd.f32 %v1363_v30, %v1362_v24 }
 0x213   :  { %v1365_v21 = vpop.f32.mrf.mxu1 }
 0x214   :  { %v1213_v25 = vadd.f32 %v1364_v53, %v1173_v41 }
 0x215   :  { %v1366_v34 = vpop.f32.mrf.mxu1 }
 0x216   :  { %1218 = vst.msk [vmem:[%s2128_s5] sm:$0xff] %vm631_vm0, %v1213_v25 }

</bundles_post_ra>
